<compile_context>
chip_gen: v7x
topology: tpu7x:2x2x1
jax: 0.10.0
libtpu: 0.0.40
codegen_flags: <defaults>
</compile_context>

<pallas_src>
from functools import partial

import jax
import jax.numpy as jnp
import numpy as np
from jax import lax
from jax.experimental import pallas as pl
from jax.experimental.pallas import tpu as pltpu

_LN_EPS = 1e-5
_INV_SQRT2 = 0.7071067811865476


def _erf_poly(x):
    """erf via Abramowitz & Stegun 7.1.26 (max abs err ~1.5e-7); VPU/EUP-only ops."""
    a1, a2, a3, a4, a5 = (0.254829592, -0.284496736, 1.421413741,
                          -1.453152027, 1.061405429)
    p = 0.3275911
    ax = jnp.abs(x)
    t = 1.0 / (1.0 + p * ax)
    poly = t * (a1 + t * (a2 + t * (a3 + t * (a4 + t * a5))))
    y = 1.0 - poly * jnp.exp(-ax * ax)
    return jnp.where(x >= 0, y, -y)


def patch_attention_kernel(x_ref, w1_ref, b1_ref, g_ref, bln_ref, w2_ref,
                           bfeat_ref, o_ref):
    # x_ref:     (1, tP, Dx)  patch-major input slab, Dx = dim*ph*pw (lane dim)
    # w1_ref:    (Dx, K)      fused (1x1 down-conv + Linear1) weight, K = ph*pw
    # b1_ref, g_ref, bln_ref, w2_ref: (1, K)  Linear1 bias, LN gamma/beta, Linear2 weight
    # bfeat_ref: (1, Dx)      per-feature beta[c] (+ Linear2 bias b2 folded in)
    # o_ref:     (1, tP, Dx)
    x = x_ref[0]                                                     # (tP, Dx)

    # Fused down-projection + first Linear: one MXU matmul (contraction = Dx).
    z = jnp.dot(x, w1_ref[...], preferred_element_type=jnp.float32) + b1_ref[...]

    # LayerNorm over the patch-score axis K (nn.LayerNorm defaults, eps=1e-5).
    mu = jnp.mean(z, axis=-1, keepdims=True)
    zc = z - mu
    var = jnp.mean(zc * zc, axis=-1, keepdims=True)
    zn = zc * lax.rsqrt(var + _LN_EPS) * g_ref[...] + bln_ref[...]

    # Exact (erf-based) GELU, as in nn.GELU().
    ge = 0.5 * zn * (1.0 + _erf_poly(zn * _INV_SQRT2))

    # Second Linear -> one attention scalar per patch (bias already in bfeat_ref).
    s = jnp.sum(ge * w2_ref[...], axis=-1, keepdims=True)            # (tP, 1)

    # out = beta * res + x * attn  ==  x * (beta_feat + b2 + s)
    o_ref[0] = (x * (bfeat_ref[...] + s)).astype(o_ref.dtype)


@partial(jax.jit, static_argnums=(2,))
def patch_attention_forward(x, params, patch_size):
    ph, pw = patch_size
    B, C, H, W = x.shape
    assert H % ph == 0 and W % pw == 0
    hs, ws = H // ph, W // pw
    P = hs * ws                    # patches per image
    K = ph * pw                    # per-patch score vector length
    Dx = C * K                     # per-patch input feature dim (lane dim)

    w_down = params["w_down"]      # (mlp_dim, C)  1x1 conv weight, bias=False
    w1 = params["w1"]              # (K, mlp_dim*K)
    b1 = params["b1"]              # (K,)
    ln_g = params["ln_gamma"]      # (K,)
    ln_b = params["ln_beta"]       # (K,)
    w2 = params["w2"]              # (1, K)
    b2 = params["b2"]              # (1,)
    beta_ch = params["beta"].reshape(C)   # (1, C, 1, 1) -> (C,)
    M = w_down.shape[0]

    # Fold the 1x1 down-conv into the first Linear (pure weight reassociation).
    w_eff = jnp.einsum("kmq,mc->kcq", w1.reshape(K, M, K), w_down).reshape(K, Dx)
    w_eff_t = jnp.transpose(w_eff)                                   # (Dx, K)

    # Per-feature residual scale beta[c] with the Linear2 bias folded in.
    bfeat = (jnp.repeat(beta_ch, K) + b2[0]).reshape(1, Dx)

    # einops 'b c (h hs) (w ws) -> b (hs ws) (c h w)'  (layout only, done by XLA).
    xp = jnp.transpose(x.reshape(B, C, ph, hs, pw, ws),
                       (0, 3, 5, 1, 2, 4)).reshape(B, P, Dx)

    # Patch tile: the whole image if small, else the biggest multiple-of-8 divisor
    # of P up to 512 (amortizes per-step overhead, fits v7x's smaller VMEM).
    if P <= 512:
        tP = P
    else:
        tP = max((t for t in range(8, 513, 8) if P % t == 0), default=P)

    out_p = pl.pallas_call(
        patch_attention_kernel,
        out_shape=jax.ShapeDtypeStruct((B, P, Dx), x.dtype),
        grid_spec=pltpu.PrefetchScalarGridSpec(
            num_scalar_prefetch=0,
            grid=(B, P // tP),
            in_specs=[
                pl.BlockSpec((1, tP, Dx), lambda b, p: (b, p, 0)),   # x patches
                pl.BlockSpec((Dx, K), lambda b, p: (0, 0)),          # fused W1
                pl.BlockSpec((1, K), lambda b, p: (0, 0)),           # b1
                pl.BlockSpec((1, K), lambda b, p: (0, 0)),           # LN gamma
                pl.BlockSpec((1, K), lambda b, p: (0, 0)),           # LN beta
                pl.BlockSpec((1, K), lambda b, p: (0, 0)),           # W2
                pl.BlockSpec((1, Dx), lambda b, p: (0, 0)),          # beta_feat (+b2)
            ],
            out_specs=pl.BlockSpec((1, tP, Dx), lambda b, p: (b, p, 0)),
        ),
        compiler_params=pltpu.CompilerParams(
            dimension_semantics=("parallel", "parallel")),
    )(xp, w_eff_t, b1.reshape(1, K), ln_g.reshape(1, K), ln_b.reshape(1, K),
      w2.reshape(1, K), bfeat)

    # inverse rearrange 'b (hs ws) (c ph pw) -> b c (ph hs) (pw ws)'
    out = jnp.transpose(out_p.reshape(B, hs, ws, C, ph, pw),
                        (0, 3, 4, 1, 5, 2)).reshape(B, C, H, W)
    return out


def _reference(x, params, patch_size):
    # Pure-JAX reference, faithful to the PyTorch op sequence (unfused).
    ph, pw = patch_size
    B, C, H, W = x.shape
    hs, ws = H // ph, W // pw
    K = ph * pw

    y = jnp.einsum("mc,bchw->bmhw", params["w_down"], x)    # 1x1 conv, no bias

    def rearr(t):
        Cc = t.shape[1]
        return jnp.transpose(t.reshape(B, Cc, ph, hs, pw, ws),
                             (0, 3, 5, 1, 2, 4)).reshape(B, hs * ws, Cc * K)

    yp, xp = rearr(y), rearr(x)
    z = yp @ params["w1"].T + params["b1"]
    mu = z.mean(-1, keepdims=True)
    var = ((z - mu) ** 2).mean(-1, keepdims=True)
    zn = (z - mu) / jnp.sqrt(var + _LN_EPS) * params["ln_gamma"] + params["ln_beta"]
    ge = 0.5 * zn * (1.0 + lax.erf(zn * _INV_SQRT2))         # exact GELU
    s = ge @ params["w2"].T + params["b2"]                   # (B, P, 1)
    xs = xp * s
    out = jnp.transpose(xs.reshape(B, hs, ws, C, ph, pw),
                        (0, 3, 4, 1, 5, 2)).reshape(B, C, H, W)
    return params["beta"] * x + out


if __name__ == "__main__":
    key = jax.random.PRNGKey(0)
    ks = jax.random.split(key, 7)

    # Small shapes; dim * ph * pw = 128 keeps the kernel's lane dim exactly 128.
    B, C, H, W = 2, 8, 16, 16
    patch = (4, 4)
    mlp_dim = 8
    K = patch[0] * patch[1]

    x = jax.random.normal(ks[0], (B, C, H, W), jnp.float32)
    params = {
        "w_down": 0.2 * jax.random.normal(ks[1], (mlp_dim, C), jnp.float32),
        "w1": 0.1 * jax.random.normal(ks[2], (K, mlp_dim * K), jnp.float32),
        "b1": 0.1 * jax.random.normal(ks[3], (K,), jnp.float32),
        "ln_gamma": jnp.ones((K,), jnp.float32),
        "ln_beta": jnp.zeros((K,), jnp.float32),
        "w2": 0.1 * jax.random.normal(ks[4], (1, K), jnp.float32),
        "b2": 0.1 * jax.random.normal(ks[5], (1,), jnp.float32),
        "beta": 0.1 * jax.random.normal(ks[6], (1, C, 1, 1), jnp.float32),
    }

    out = jax.block_until_ready(patch_attention_forward(x, params, patch))
    ref = jax.block_until_ready(_reference(x, params, patch))

    assert out.shape == (B, C, H, W)
    assert np.allclose(np.asarray(out), np.asarray(ref), atol=2e-4, rtol=2e-4)
    print("KERNEL_OK")
</pallas_src>

<mosaic_0001>
module attributes {stable_mosaic.version = 11 : i64} {
  func.func @patch_attention_kernel(%arg0: i32, %arg1: i32, %arg2: memref<1x16x128xf32, #tpu.memory_space<vmem>>, %arg3: memref<128x16xf32, #tpu.memory_space<vmem>>, %arg4: memref<1x16xf32, #tpu.memory_space<vmem>>, %arg5: memref<1x16xf32, #tpu.memory_space<vmem>>, %arg6: memref<1x16xf32, #tpu.memory_space<vmem>>, %arg7: memref<1x16xf32, #tpu.memory_space<vmem>>, %arg8: memref<1x128xf32, #tpu.memory_space<vmem>>, %arg9: memref<1x16x128xf32, #tpu.memory_space<vmem>>) attributes {dimension_semantics = [#tpu.dimension_semantics<parallel>, #tpu.dimension_semantics<parallel>], iteration_bounds = array<i64: 2, 1>, scalar_prefetch = 0 : i64, scratch_operands = 0 : i64, tpu.core_type = #tpu.core_type<tc>, window_params = [{transform_indices = @transform_0, window_bounds = array<i64: 1, 16, 128>}, {pipeline_mode = #tpu.pipeline_mode<synchronous>, transform_indices = @transform_1, window_bounds = array<i64: 128, 16>}, {pipeline_mode = #tpu.pipeline_mode<synchronous>, transform_indices = @transform_2, window_bounds = array<i64: 1, 16>}, {pipeline_mode = #tpu.pipeline_mode<synchronous>, transform_indices = @transform_3, window_bounds = array<i64: 1, 16>}, {pipeline_mode = #tpu.pipeline_mode<synchronous>, transform_indices = @transform_4, window_bounds = array<i64: 1, 16>}, {pipeline_mode = #tpu.pipeline_mode<synchronous>, transform_indices = @transform_5, window_bounds = array<i64: 1, 16>}, {pipeline_mode = #tpu.pipeline_mode<synchronous>, transform_indices = @transform_6, window_bounds = array<i64: 1, 128>}, {transform_indices = @transform_7, window_bounds = array<i64: 1, 16, 128>}]} {
    %c0 = arith.constant 0 : index
    %c0_0 = arith.constant 0 : index
    %c0_1 = arith.constant 0 : index
    %0 = vector.load %arg2[%c0, %c0_0, %c0_1] : memref<1x16x128xf32, #tpu.memory_space<vmem>>, vector<1x16x128xf32>
    %1 = vector.shape_cast %0 : vector<1x16x128xf32> to vector<16x128xf32>
    %c0_2 = arith.constant 0 : index
    %c0_3 = arith.constant 0 : index
    %2 = vector.load %arg3[%c0_2, %c0_3] : memref<128x16xf32, #tpu.memory_space<vmem>>, vector<128x16xf32>
    %cst = arith.constant dense<0.000000e+00> : vector<16x16xf32>
    %3 = tpu.matmul %1, %2, %cst {dimension_numbers = #tpu.dot_dimension_numbers<[1], [0], [0], [1], [0, 0, 1, 1], [], []>} : vector<16x128xf32>, vector<128x16xf32>, vector<16x16xf32> -> vector<16x16xf32>
    %c0_4 = arith.constant 0 : index
    %c0_5 = arith.constant 0 : index
    %4 = vector.load %arg4[%c0_4, %c0_5] : memref<1x16xf32, #tpu.memory_space<vmem>>, vector<1x16xf32>
    %5 = vector.broadcast %4 : vector<1x16xf32> to vector<16x16xf32>
    %6 = arith.addf %3, %5 : vector<16x16xf32>
    %cst_6 = arith.constant dense<0.000000e+00> : vector<16xf32>
    %7 = vector.multi_reduction <add>, %6, %cst_6 [1] : vector<16x16xf32> to vector<16xf32>
    %8 = vector.shape_cast %7 : vector<16xf32> to vector<16x1xf32>
    %cst_7 = arith.constant 1.600000e+01 : f32
    %9 = vector.broadcast %cst_7 : f32 to vector<16x1xf32>
    %10 = arith.divf %8, %9 : vector<16x1xf32>
    %11 = vector.broadcast %10 : vector<16x1xf32> to vector<16x16xf32>
    %12 = arith.subf %6, %11 : vector<16x16xf32>
    %13 = arith.mulf %12, %12 : vector<16x16xf32>
    %cst_8 = arith.constant dense<0.000000e+00> : vector<16xf32>
    %14 = vector.multi_reduction <add>, %13, %cst_8 [1] : vector<16x16xf32> to vector<16xf32>
    %15 = vector.shape_cast %14 : vector<16xf32> to vector<16x1xf32>
    %cst_9 = arith.constant 1.600000e+01 : f32
    %16 = vector.broadcast %cst_9 : f32 to vector<16x1xf32>
    %17 = arith.divf %15, %16 : vector<16x1xf32>
    %cst_10 = arith.constant 9.99999974E-6 : f32
    %18 = vector.broadcast %cst_10 : f32 to vector<16x1xf32>
    %19 = arith.addf %17, %18 : vector<16x1xf32>
    %20 = math.rsqrt %19 : vector<16x1xf32>
    %21 = vector.broadcast %20 : vector<16x1xf32> to vector<16x16xf32>
    %22 = arith.mulf %12, %21 : vector<16x16xf32>
    %c0_11 = arith.constant 0 : index
    %c0_12 = arith.constant 0 : index
    %23 = vector.load %arg5[%c0_11, %c0_12] : memref<1x16xf32, #tpu.memory_space<vmem>>, vector<1x16xf32>
    %24 = vector.broadcast %23 : vector<1x16xf32> to vector<16x16xf32>
    %25 = arith.mulf %22, %24 : vector<16x16xf32>
    %c0_13 = arith.constant 0 : index
    %c0_14 = arith.constant 0 : index
    %26 = vector.load %arg6[%c0_13, %c0_14] : memref<1x16xf32, #tpu.memory_space<vmem>>, vector<1x16xf32>
    %27 = vector.broadcast %26 : vector<1x16xf32> to vector<16x16xf32>
    %28 = arith.addf %25, %27 : vector<16x16xf32>
    %cst_15 = arith.constant 5.000000e-01 : f32
    %29 = vector.broadcast %cst_15 : f32 to vector<16x16xf32>
    %30 = arith.mulf %29, %28 : vector<16x16xf32>
    %cst_16 = arith.constant 0.707106769 : f32
    %31 = vector.broadcast %cst_16 : f32 to vector<16x16xf32>
    %32 = arith.mulf %28, %31 : vector<16x16xf32>
    %33 = math.absf %32 : vector<16x16xf32>
    %cst_17 = arith.constant 0.327591091 : f32
    %34 = vector.broadcast %cst_17 : f32 to vector<16x16xf32>
    %35 = arith.mulf %34, %33 : vector<16x16xf32>
    %cst_18 = arith.constant 1.000000e+00 : f32
    %36 = vector.broadcast %cst_18 : f32 to vector<16x16xf32>
    %37 = arith.addf %36, %35 : vector<16x16xf32>
    %cst_19 = arith.constant 1.000000e+00 : f32
    %38 = vector.broadcast %cst_19 : f32 to vector<16x16xf32>
    %39 = arith.divf %38, %37 : vector<16x16xf32>
    %cst_20 = arith.constant 1.06140542 : f32
    %40 = vector.broadcast %cst_20 : f32 to vector<16x16xf32>
    %41 = arith.mulf %39, %40 : vector<16x16xf32>
    %cst_21 = arith.constant -1.45315206 : f32
    %42 = vector.broadcast %cst_21 : f32 to vector<16x16xf32>
    %43 = arith.addf %42, %41 : vector<16x16xf32>
    %44 = arith.mulf %39, %43 : vector<16x16xf32>
    %cst_22 = arith.constant 1.42141378 : f32
    %45 = vector.broadcast %cst_22 : f32 to vector<16x16xf32>
    %46 = arith.addf %45, %44 : vector<16x16xf32>
    %47 = arith.mulf %39, %46 : vector<16x16xf32>
    %cst_23 = arith.constant -0.284496725 : f32
    %48 = vector.broadcast %cst_23 : f32 to vector<16x16xf32>
    %49 = arith.addf %48, %47 : vector<16x16xf32>
    %50 = arith.mulf %39, %49 : vector<16x16xf32>
    %cst_24 = arith.constant 0.254829586 : f32
    %51 = vector.broadcast %cst_24 : f32 to vector<16x16xf32>
    %52 = arith.addf %51, %50 : vector<16x16xf32>
    %53 = arith.mulf %39, %52 : vector<16x16xf32>
    %cst_25 = arith.constant 0.000000e+00 : f32
    %54 = vector.broadcast %cst_25 : f32 to vector<16x16xf32>
    %55 = arith.subf %54, %33 : vector<16x16xf32>
    %56 = arith.mulf %55, %33 : vector<16x16xf32>
    %57 = math.exp %56 : vector<16x16xf32>
    %58 = arith.mulf %53, %57 : vector<16x16xf32>
    %cst_26 = arith.constant 1.000000e+00 : f32
    %59 = vector.broadcast %cst_26 : f32 to vector<16x16xf32>
    %60 = arith.subf %59, %58 : vector<16x16xf32>
    %cst_27 = arith.constant 0.000000e+00 : f32
    %61 = vector.broadcast %cst_27 : f32 to vector<16x16xf32>
    %62 = arith.cmpf oge, %32, %61 : vector<16x16xf32>
    %cst_28 = arith.constant 0.000000e+00 : f32
    %63 = vector.broadcast %cst_28 : f32 to vector<16x16xf32>
    %64 = arith.subf %63, %60 : vector<16x16xf32>
    %65 = arith.select %62, %60, %64 : vector<16x16xi1>, vector<16x16xf32>
    %cst_29 = arith.constant 1.000000e+00 : f32
    %66 = vector.broadcast %cst_29 : f32 to vector<16x16xf32>
    %67 = arith.addf %66, %65 : vector<16x16xf32>
    %68 = arith.mulf %30, %67 : vector<16x16xf32>
    %c0_30 = arith.constant 0 : index
    %c0_31 = arith.constant 0 : index
    %69 = vector.load %arg7[%c0_30, %c0_31] : memref<1x16xf32, #tpu.memory_space<vmem>>, vector<1x16xf32>
    %70 = vector.broadcast %69 : vector<1x16xf32> to vector<16x16xf32>
    %71 = arith.mulf %68, %70 : vector<16x16xf32>
    %cst_32 = arith.constant dense<0.000000e+00> : vector<16xf32>
    %72 = vector.multi_reduction <add>, %71, %cst_32 [1] : vector<16x16xf32> to vector<16xf32>
    %73 = vector.shape_cast %72 : vector<16xf32> to vector<16x1xf32>
    %c0_33 = arith.constant 0 : index
    %c0_34 = arith.constant 0 : index
    %74 = vector.load %arg8[%c0_33, %c0_34] : memref<1x128xf32, #tpu.memory_space<vmem>>, vector<1x128xf32>
    %75 = vector.broadcast %74 : vector<1x128xf32> to vector<16x128xf32>
    %76 = vector.broadcast %73 : vector<16x1xf32> to vector<16x128xf32>
    %77 = arith.addf %75, %76 : vector<16x128xf32>
    %78 = arith.mulf %1, %77 : vector<16x128xf32>
    %c0_35 = arith.constant 0 : index
    %c0_36 = arith.constant 0 : index
    %c0_37 = arith.constant 0 : index
    %79 = vector.load %arg9[%c0_35, %c0_36, %c0_37] : memref<1x16x128xf32, #tpu.memory_space<vmem>>, vector<1x16x128xf32>
    %80 = vector.shape_cast %79 : vector<1x16x128xf32> to vector<16x128xf32>
    %81 = vector.shape_cast %78 : vector<16x128xf32> to vector<1x16x128xf32>
    tpu.vector_store %arg9[%c0_35, %c0_36, %c0_37], %81 {strides = array<i32>} : memref<1x16x128xf32, #tpu.memory_space<vmem>>, vector<1x16x128xf32>,
    return
  }
  func.func @transform_0(%arg0: i32, %arg1: i32) -> (i32, i32, i32) {
    %c0_i32 = arith.constant 0 : i32
    %c0_i32_0 = arith.constant 0 : i32
    return %arg0, %arg1, %c0_i32 : i32, i32, i32
  }
  func.func @transform_1(%arg0: i32, %arg1: i32) -> (i32, i32) {
    %c0_i32 = arith.constant 0 : i32
    %c0_i32_0 = arith.constant 0 : i32
    %c0_i32_1 = arith.constant 0 : i32
    return %c0_i32, %c0_i32_0 : i32, i32
  }
  func.func @transform_2(%arg0: i32, %arg1: i32) -> (i32, i32) {
    %c0_i32 = arith.constant 0 : i32
    %c0_i32_0 = arith.constant 0 : i32
    %c0_i32_1 = arith.constant 0 : i32
    return %c0_i32, %c0_i32_0 : i32, i32
  }
  func.func @transform_3(%arg0: i32, %arg1: i32) -> (i32, i32) {
    %c0_i32 = arith.constant 0 : i32
    %c0_i32_0 = arith.constant 0 : i32
    %c0_i32_1 = arith.constant 0 : i32
    return %c0_i32, %c0_i32_0 : i32, i32
  }
  func.func @transform_4(%arg0: i32, %arg1: i32) -> (i32, i32) {
    %c0_i32 = arith.constant 0 : i32
    %c0_i32_0 = arith.constant 0 : i32
    %c0_i32_1 = arith.constant 0 : i32
    return %c0_i32, %c0_i32_0 : i32, i32
  }
  func.func @transform_5(%arg0: i32, %arg1: i32) -> (i32, i32) {
    %c0_i32 = arith.constant 0 : i32
    %c0_i32_0 = arith.constant 0 : i32
    %c0_i32_1 = arith.constant 0 : i32
    return %c0_i32, %c0_i32_0 : i32, i32
  }
  func.func @transform_6(%arg0: i32, %arg1: i32) -> (i32, i32) {
    %c0_i32 = arith.constant 0 : i32
    %c0_i32_0 = arith.constant 0 : i32
    %c0_i32_1 = arith.constant 0 : i32
    return %c0_i32, %c0_i32_0 : i32, i32
  }
  func.func @transform_7(%arg0: i32, %arg1: i32) -> (i32, i32, i32) {
    %c0_i32 = arith.constant 0 : i32
    %c0_i32_0 = arith.constant 0 : i32
    return %arg0, %arg1, %c0_i32 : i32, i32, i32
  }
}

</mosaic_0001>

<bundles_post_ra>
// kernel: patch_attention_forward.1
= control target key start
LH: loop header
LB: loop body
LE: loop exit
PB: predicated region body
PF: predicated region fallthrough
CT: control target
= control target key end

     0   :  { %s836_s24 = smov 0   ;;  %s838_s25 = smov 0   ;;  %s957_s0 = inlined_call_operand.vmem [shape: f32[2,16,128], index: 0, kind: input, shape index: {}]   ;;  %s958_s1 = inlined_call_operand.vmem [shape: f32[128,16], index: 1, kind: input, shape index: {}]   ;;  %s959_s2 = inlined_call_operand.vmem [shape: f32[1,16], index: 2, kind: input, shape index: {}]   ;;  %s960_s3 = inlined_call_operand.vmem [shape: f32[1,16], index: 3, kind: input, shape index: {}]   ;;  %s961_s4 = inlined_call_operand.vmem [shape: f32[1,16], index: 4, kind: input, shape index: {}]   ;;  %s962_s5 = inlined_call_operand.vmem [shape: f32[1,16], index: 5, kind: input, shape index: {}]   ;;  %s963_s6 = inlined_call_operand.vmem [shape: f32[1,128], index: 6, kind: input, shape index: {}]   ;;  %s964_s7 = inlined_call_operand.vmem [shape: f32[2,16,128], index: 7, kind: output, shape index: {}]  }
   0x1   :  { %s840_s26 = smov 0  }
   0x2 LB: > { %s29_s27 = sadd.s32 1, %s790_s25  ;;  %p637_p0 = scmp.ge.s32.totalorder %s794_s26, 1  ;;  %s794_s26 = sphi %s840_s26, %s17_s26   ;;  %s790_s25 = sphi %s838_s25, %s966_s25   ;;  %s786_s24 = sphi %s836_s24, %s965_s24  }
   0x3   : > { %p31_p1 = scmp.ge.s32.totalorder %s29_s27, 2  ;;  %p258_p2 = scmp.lt.s32.totalorder %s794_s26, 3 }
   0x5   : > { %s968_s27 = smov (%p31_p1, %s29_s27), 0  ;;  %p259_p3 = pnand %p637_p0, %p258_p2 }
   0x6   : > { %v320_v0 = vld [vmem:[%s958_s1] sm:$0xff] (!%p259_p3)  ;;  %v321_v1 = vld [vmem:[%s958_s1 + $0x8] sm:$0xff] (!%p259_p3)  ;;  %v322_v2 = vld [vmem:[%s958_s1 + $0x10] sm:$0xff] (!%p259_p3)  ;;  %p299_p4 = scmp.lt.s32.totalorder (!%p259_p3), %s786_s24, 1  ;;  %vm418_vm0 = vcmask (!%p259_p3), 130048  }
   0x7   : > { %262 = sbr.rel (%p259_p3) target bundleno = 771 (0x303), region = 48  ;;  %v704_v3 = vpack.c.bf16 (!%p259_p3), %v321_v1, %v320_v0  ;;  %v323_v4 = vld [vmem:[%s958_s1 + $0x18] sm:$0xff] (!%p259_p3)  ;;  %v324_v6 = vld [vmem:[%s958_s1 + $0x20] sm:$0xff] (!%p259_p3)  ;;  %v325_v7 = vld [vmem:[%s958_s1 + $0x28] sm:$0xff] (!%p259_p3) }
   0x8   : > { %v708_v5 = vpack.c.bf16 (!%p259_p3), %v323_v4, %v322_v2  ;;  %v712_v8 = vpack.c.bf16 (!%p259_p3), %v325_v7, %v324_v6  ;;  %v326_v9 = vld [vmem:[%s958_s1 + $0x30] sm:$0xff] (!%p259_p3)  ;;  %v327_v10 = vld [vmem:[%s958_s1 + $0x38] sm:$0xff] (!%p259_p3)  ;;  %v328_v13 = vld [vmem:[%s958_s1 + $0x40] sm:$0xff] (!%p259_p3) }
   0x9   : > { %705 = vmatprep.subr.bf16.mxu0 (!%p259_p3), %v704_v3  ;;  %v716_v12 = vpack.c.bf16 (!%p259_p3), %v327_v10, %v326_v9  ;;  %v329_v14 = vld [vmem:[%s958_s1 + $0x48] sm:$0xff] (!%p259_p3)  ;;  %v330_v16 = vld [vmem:[%s958_s1 + $0x50] sm:$0xff] (!%p259_p3)  ;;  %v331_v17 = vld [vmem:[%s958_s1 + $0x58] sm:$0xff] (!%p259_p3) }
   0xa   : > { %707 = vmatpush3.bf16.msra.mxu0 (!%p259_p3), %v704_v3  ;;  %v720_v15 = vpack.c.bf16 (!%p259_p3), %v329_v14, %v328_v13  ;;  %v724_v18 = vpack.c.bf16 (!%p259_p3), %v331_v17, %v330_v16  ;;  %v332_v19 = vld [vmem:[%s958_s1 + $0x60] sm:$0xff] (!%p259_p3)  ;;  %v333_v20 = vld [vmem:[%s958_s1 + $0x68] sm:$0xff] (!%p259_p3)  ;;  %v334_v22 = vld [vmem:[%s958_s1 + $0x70] sm:$0xff] (!%p259_p3) }
   0xb   : > { %709 = vmatprep.subr.bf16.mxu0 (!%p259_p3), %v708_v5  ;;  %v728_v21 = vpack.c.bf16 (!%p259_p3), %v333_v20, %v332_v19  ;;  %v335_v23 = vld [vmem:[%s958_s1 + $0x78] sm:$0xff] (!%p259_p3)  ;;  %v642_v26 = vld [vmem:[%s959_s2] ss:$0 sm:$0xff] (!%p259_p3) }
   0xc   : > { %v732_v24 = vpack.c.bf16 (!%p259_p3), %v335_v23, %v334_v22  ;;  %v643_v50 = vld [vmem:[%s960_s3] ss:$0 sm:$0xff] (!%p259_p3) }
   0xd   : > { %v644_v52 = vld [vmem:[%s961_s4] ss:$0 sm:$0xff] (!%p259_p3) }
   0xe   : > { %s970_s24 = smov (!%p299_p4, %s786_s24), 1  ;;  %711 = vmatpush3.bf16.msra.mxu0 %v708_v5 }
   0xf   : > { %s649_s17 = sshll.u32 %s970_s24, 4  ;;  %713 = vmatprep.subr.bf16.mxu0 %v712_v8 }
  0x10   : > { %s880_s20 = scalar_lea.vmem %s957_s0, %s649_s17  ;;  %s316_s16 = scalar_lea.vmem %s964_s7, %s649_s17 }
  0x11   : > { %v889_v11 = vld [vmem:[%s880_s20] sm:$0xff]  ;;  %v917_v25 = vld [vmem:[%s880_s20 + $0x8] sm:$0xff] }
  0x12   : > { %701 = vmatprep.mubr.f32.mxu0 %v889_v11  ;;  %715 = vmatpush3.bf16.msra.mxu0 %v712_v8 }
  0x13   : > { %717 = vmatprep.subr.bf16.mxu0 %v716_v12 }
  0x16   : > { %719 = vmatpush3.bf16.msra.mxu0 %v716_v12 }
  0x17   : > { %721 = vmatprep.subr.bf16.mxu0 %v720_v15 }
  0x1a   : > { %723 = vmatpush3.bf16.msra.mxu0 %v720_v15 }
  0x1b   : > { %725 = vmatprep.subr.bf16.mxu0 %v724_v18 }
  0x1e   : > { %727 = vmatpush3.bf16.msra.mxu0 %v724_v18 }
  0x1f   : > { %729 = vmatprep.subr.bf16.mxu0 %v728_v21 }
  0x22   : > { %731 = vmatpush3.bf16.msra.mxu0 %v728_v21 }
  0x23   : > { %733 = vmatprep.subr.bf16.mxu0 %v732_v24 }
  0x26   : > { %735 = vmatpush3.bf16.msra.mxu0 %v732_v24 }
  0x29   : > { %702 = vmatmul.mubr.f32.vlgmr.msra.gmra.mrb[0].mxu0 %v917_v25 }
  0xfc   : > { %v703_v27 = vpop.f32.mrb[0].mxu0 }
  0xfd   : > { %v409_v28 = vpop.f32.mrb[1].mxu0  ;;  %v415_v30 = vadd.f32 %v703_v27, %v642_v26 }
  0xfe   : > { %v410_v29 = vadd.f32 %v642_v26, %v409_v28 }
  0xff   : > { %v422_v32 = vsel %vm418_vm0, %v415_v30, 0.0 }
 0x100   : > { %v419_v31 = vsel %vm418_vm0, %v410_v29, 0.0 }
 0x101   : > { %420 = vadd.xlane.f32.xlu0 %v419_v31 }
 0x105   : > { %423 = vadd.xlane.f32.xlu0 %v422_v32 }
 0x18e   : > { %v421_v33 = vpop.xlane.xlu0 %420 }
 0x18f   : > { %v426_v34 = vmul.f32 0.0625, %v421_v33 }
 0x191   : > { %v428_v35 = vsub.f32 %v410_v29, %v426_v34 }
 0x192   : > { %v424_v36 = vpop.xlane.xlu0 %423 }
 0x193   : > { %v427_v37 = vmul.f32 0.0625, %v424_v36  ;;  %v430_v38 = vmul.f32 %v428_v35, %v428_v35 }
 0x195   : > { %v429_v39 = vsub.f32 %v415_v30, %v427_v37  ;;  %v432_v40 = vsel %vm418_vm0, %v430_v38, 0.0 }
 0x196   : > { %433 = vadd.xlane.f32.xlu1 %v432_v40 }
 0x197   : > { %v431_v41 = vmul.f32 %v429_v39, %v429_v39 }
 0x199   : > { %v435_v42 = vsel %vm418_vm0, %v431_v41, 0.0  ;;  %v645_v41 = vld [vmem:[%s962_s5] ss:$0 sm:$0xff] }
 0x19a   : > { %436 = vadd.xlane.f32.xlu1 %v435_v42 }
 0x223   : > { %v434_v43 = vpop.xlane.xlu1 %433 }
 0x224   : > { %v438_v44 = vmul.f32 0.0625, %v434_v43 }
 0x226   : > { %v440_v45 = vadd.f32 1e-05, %v438_v44 }
 0x227   : > { %v437_v46 = vpop.xlane.xlu1 %436 }
 0x228   : > { %760 = vrsqrt.f32 %v440_v45  ;;  %v439_v47 = vmul.f32 0.0625, %v437_v46 }
 0x22a   : > { %v441_v48 = vadd.f32 1e-05, %v439_v47 }
 0x22c   : > { %762 = vrsqrt.f32 %v441_v48 }
 0x232   : > { %v761_v49 = vpop.eup %760 }
 0x233   : > { %v444_v51 = vmul.f32 %v761_v49, %v428_v35 }
 0x235   : > { %v453_v53 = vmul.f32 %v643_v50, %v444_v51 }
 0x236   : > { %v763_v54 = vpop.eup %762 }
 0x237   : > { %v462_v55 = vadd.f32 %v644_v52, %v453_v53  ;;  %v445_v56 = vmul.f32 %v763_v54, %v429_v39 }
 0x239   : > { %v466_v57 = vmul.f32 0.70710677, %v462_v55  ;;  %v454_v58 = vmul.f32 %v643_v50, %v445_v56  ;;  %v464_v39 = vmul.f32 0.5, %v462_v55 }
 0x23b   : > { %v468_v59 = vand.u32 2147483647, %v466_v57  ;;  %v463_v60 = vadd.f32 %v644_v52, %v454_v58  ;;  %vm508_vm1 = vcmp.ge.f32.partialorder %v466_v57, 0.0  ;;  %v646_v52 = vld [vmem:[%s963_s6] ss:$0 sm:$0xff] }
 0x23d   : > { %v470_v61 = vmul.f32 0.3275911, %v468_v59  ;;  %v467_v62 = vmul.f32 0.70710677, %v463_v60  ;;  %v496_v3 = vsub.f32 0.0, %v468_v59  ;;  %v465_v46 = vmul.f32 0.5, %v463_v60 }
 0x23f   : > { %v472_v63 = vadd.f32 1.0, %v470_v61  ;;  %v469_v0 = vand.u32 2147483647, %v467_v62  ;;  %v498_v5 = vmul.f32 %v496_v3, %v468_v59  ;;  %vm509_vm2 = vcmp.ge.f32.partialorder %v467_v62, 0.0 }
 0x241   : > { %764 = vrcp.f32 %v472_v63  ;;  %v471_v1 = vmul.f32 0.3275911, %v469_v0  ;;  %v497_v6 = vsub.f32 0.0, %v469_v0  ;;  %v500_v10 = vmul.f32 1.442695, %v498_v5 }
 0x243   : > { %v473_v2 = vadd.f32 1.0, %v471_v1  ;;  %v499_v12 = vmul.f32 %v497_v6, %v469_v0 }
 0x245   : > { %766 = vrcp.f32 %v473_v2  ;;  %v502_v17 = vmul.f32 1.442695, %v499_v12 }
 0x246   : > { %768 = vpow2.f32 %v500_v10 }
 0x247   : > { %770 = vpow2.f32 %v502_v17 }
 0x24b   : > { %v765_v4 = vpop.eup %764 }
 0x24c   : > { %v478_v7 = vmul.f32 1.0614054, %v765_v4 }
 0x24e   : > { %v480_v8 = vadd.f32 -1.4531521, %v478_v7 }
 0x24f   : > { %v767_v9 = vpop.eup %766 }
 0x250   : > { %v482_v13 = vmul.f32 %v765_v4, %v480_v8  ;;  %v479_v14 = vmul.f32 1.0614054, %v767_v9  ;;  %v769_v29 = vpop.eup %768 }
 0x251   : > { %v771_v34 = vpop.eup %770 }
 0x252   : > { %v484_v15 = vadd.f32 1.4214138, %v482_v13  ;;  %v481_v16 = vadd.f32 -1.4531521, %v479_v14 }
 0x254   : > { %v486_v18 = vmul.f32 %v765_v4, %v484_v15  ;;  %v483_v19 = vmul.f32 %v767_v9, %v481_v16 }
 0x256   : > { %v488_v20 = vadd.f32 -0.28449672, %v486_v18  ;;  %v485_v21 = vadd.f32 1.4214138, %v483_v19 }
 0x258   : > { %v490_v22 = vmul.f32 %v765_v4, %v488_v20  ;;  %v487_v23 = vmul.f32 %v767_v9, %v485_v21 }
 0x25a   : > { %v492_v24 = vadd.f32 0.2548296, %v490_v22  ;;  %v489_v26 = vadd.f32 -0.28449672, %v487_v23 }
 0x25c   : > { %v494_v27 = vmul.f32 %v765_v4, %v492_v24  ;;  %v491_v28 = vmul.f32 %v767_v9, %v489_v26 }
 0x25e   : > { %v504_v30 = vmul.f32 %v769_v29, %v494_v27  ;;  %v493_v31 = vadd.f32 0.2548296, %v491_v28 }
 0x260   : > { %v506_v32 = vsub.f32 1.0, %v504_v30  ;;  %v495_v33 = vmul.f32 %v767_v9, %v493_v31 }
 0x262   : > { %v510_v35 = vsub.f32 0.0, %v506_v32  ;;  %v505_v36 = vmul.f32 %v771_v34, %v495_v33 }
 0x264   : > { %v512_v37 = vsel %vm508_vm1, %v506_v32, %v510_v35  ;;  %v507_v38 = vsub.f32 1.0, %v505_v36 }
 0x265   : > { %v514_v40 = vadd.f32 1.0, %v512_v37 }
 0x266   : > { %v511_v42 = vsub.f32 0.0, %v507_v38 }
 0x267   : > { %v516_v43 = vmul.f32 %v514_v40, %v464_v39 }
 0x268   : > { %v513_v44 = vsel %vm509_vm2, %v507_v38, %v511_v42 }
 0x269   : > { %v525_v45 = vmul.f32 %v645_v41, %v516_v43  ;;  %v515_v47 = vadd.f32 1.0, %v513_v44 }
 0x26b   : > { %v527_v48 = vsel %vm418_vm0, %v525_v45, 0.0  ;;  %v517_v49 = vmul.f32 %v515_v47, %v465_v46 }
 0x26c   : > { %528 = vadd.xlane.f32.xlu0 %v527_v48 }
 0x26d   : > { %v526_v50 = vmul.f32 %v645_v41, %v517_v49 }
 0x26f   : > { %v530_v51 = vsel %vm418_vm0, %v526_v50, 0.0 }
 0x270   : > { %531 = vadd.xlane.f32.xlu1 %v530_v51 }
 0x2f9   : > { %v529_v53 = vpop.xlane.xlu0 %528 }
 0x2fa   : > { %v540_v54 = vadd.f32 %v646_v52, %v529_v53 }
 0x2fc   : > { %v542_v55 = vmul.f32 %v540_v54, %v889_v11 }
 0x2fd   : > { %v532_v56 = vpop.xlane.xlu1 %531 }
 0x2fe   : > { %544 = vst [vmem:[%s316_s16] sm:$0xff] %v542_v55  ;;  %v541_v57 = vadd.f32 %v646_v52, %v532_v56 }
 0x300   : > { %v543_v58 = vmul.f32 %v541_v57, %v917_v25 }
 0x302   : > { %545 = vst [vmem:[%s316_s16 + $0x8] sm:$0xff] %v543_v58 }
 0x303 PF: > { %s17_s26 = sadd.s32 1, %s794_s26   ;;  %s965_s24 = smov %s790_s25 }
 0x304   : > { %p14_p5 = scmp.ge.s32.totalorder %s17_s26, 4   ;;  %s966_s25 = smov %s968_s27 }
 0x306   :  { %16 = sbr.rel (!%p14_p5) target bundleno = 2 (0x2), region = 78 }

</bundles_post_ra>
